<compile_context>
chip_gen: v7x
topology: tpu7x:2x2x1
jax: 0.10.0
libtpu: 0.0.40
codegen_flags: <defaults>
</compile_context>

<pallas_src>
import math
import functools

import jax
import jax.numpy as jnp
from jax import lax
from jax.experimental import pallas as pl
from jax.experimental.pallas import tpu as pltpu


# ----------------------------------------------------------------------------
# ALiBi slopes (direct port of torch _get_alibi_slopes)
# ----------------------------------------------------------------------------
def _get_alibi_slopes(total_num_heads: int) -> jnp.ndarray:
    closest_power_of_2 = 2 ** math.floor(math.log2(total_num_heads))
    base = 2 ** (-(2 ** (-(math.log2(closest_power_of_2) - 3))))
    powers = jnp.arange(1, 1 + closest_power_of_2, dtype=jnp.float32)
    slopes = jnp.power(jnp.float32(base), powers)
    if closest_power_of_2 != total_num_heads:
        extra_base = 2 ** (-(2 ** (-(math.log2(2 * closest_power_of_2) - 3))))
        num_remaining = min(closest_power_of_2, total_num_heads - closest_power_of_2)
        extra_powers = jnp.arange(1, 1 + 2 * num_remaining, 2, dtype=jnp.float32)
        slopes = jnp.concatenate([slopes, jnp.power(jnp.float32(extra_base), extra_powers)])
    return slopes


# ----------------------------------------------------------------------------
# Kernel 1: tiled matmul (W_pack and o_proj), bf16 MXU operands, fp32 accumulator
# ----------------------------------------------------------------------------
def _matmul_kernel(x_ref, w_ref, o_ref, acc_ref):
    @pl.when(pl.program_id(2) == 0)
    def _():
        acc_ref[...] = jnp.zeros_like(acc_ref)

    acc_ref[...] += jnp.dot(x_ref[...], w_ref[...], preferred_element_type=jnp.float32)

    @pl.when(pl.program_id(2) == pl.num_programs(2) - 1)
    def _():
        o_ref[...] = acc_ref[...].astype(o_ref.dtype)


def pallas_matmul(x, w, out_dtype=jnp.float32, tm=256, tn=256, tk=256):
    M, K = x.shape
    K2, N = w.shape
    assert K == K2
    tm, tn, tk = min(tm, M), min(tn, N), min(tk, K)
    assert M % tm == 0 and N % tn == 0 and K % tk == 0, "shapes must tile evenly"
    grid = (M // tm, N // tn, K // tk)
    return pl.pallas_call(
        _matmul_kernel,
        out_shape=jax.ShapeDtypeStruct((M, N), out_dtype),
        grid_spec=pltpu.PrefetchScalarGridSpec(
            num_scalar_prefetch=0,
            grid=grid,
            in_specs=[
                pl.BlockSpec((tm, tk), lambda i, j, k: (i, k)),
                pl.BlockSpec((tk, tn), lambda i, j, k: (k, j)),
            ],
            out_specs=pl.BlockSpec((tm, tn), lambda i, j, k: (i, j)),
            scratch_shapes=[pltpu.VMEM((tm, tn), jnp.float32)],
        ),
        compiler_params=pltpu.CompilerParams(
            dimension_semantics=("parallel", "parallel", "arbitrary")
        ),
    )(x, w)


# ----------------------------------------------------------------------------
# Kernel 2: flash-style causal attention over the packed QKV tensor.
#   grid = (num_heads, q_tiles, kv_tiles)   (kv reduction axis last, "arbitrary")
#   ROPE mode : q/k/v tiles + cos/sin tiles (rope applied in-kernel via pltpu.roll)
#   ALIBI mode: slopes in SMEM + q/k/v tiles
# ----------------------------------------------------------------------------
def _flash_attn_kernel(*args, scale, tq, tkv, head_dim, use_rope):
    if use_rope:
        (q_ref, k_ref, v_ref, cos_q_ref, sin_q_ref, cos_k_ref, sin_k_ref,
         o_ref, m_sc, l_sc, acc_sc, q_sc) = args
        slopes_ref = None
    else:
        (slopes_ref, q_ref, k_ref, v_ref,
         o_ref, m_sc, l_sc, acc_sc, q_sc) = args

    h = pl.program_id(0)
    qi = pl.program_id(1)
    ki = pl.program_id(2)
    num_kv = pl.num_programs(2)

    q_start = qi * tq
    k_start = ki * tkv

    # Per-(head, q-tile) setup: running stats + RoPE'd / pre-scaled q cached in VMEM.
    @pl.when(ki == 0)
    def _init():
        m_sc[...] = jnp.full_like(m_sc, -jnp.inf)
        l_sc[...] = jnp.zeros_like(l_sc)
        acc_sc[...] = jnp.zeros_like(acc_sc)
        q = q_ref[...].astype(jnp.float32)
        if use_rope:
            # neox rotate-half: rot(x) = x*[cos,cos] + roll(x, D/2)*[-sin, sin]
            q = q * cos_q_ref[...] + pltpu.roll(q, shift=head_dim // 2, axis=1) * sin_q_ref[...]
        q_sc[...] = (q * scale).astype(jnp.bfloat16)   # softmax scale folded into q

    # Causal skip: tiles entirely above the diagonal do no compute (and their DMAs
    # are also skipped via the clamped index_maps in the wrapper).
    @pl.when(k_start <= q_start + (tq - 1))
    def _compute():
        if use_rope:
            k = k_ref[...].astype(jnp.float32)
            k = k * cos_k_ref[...] + pltpu.roll(k, shift=head_dim // 2, axis=1) * sin_k_ref[...]
            k = k.astype(jnp.bfloat16)
        else:
            k = k_ref[...]

        # scores: bf16 MXU operands, fp32 accumulation; contraction fed directly
        # (no materialized K transpose).
        s = lax.dot_general(
            q_sc[...], k,
            dimension_numbers=(((1,), (1,)), ((), ())),
            preferred_element_type=jnp.float32,
        )

        row = q_start + lax.broadcasted_iota(jnp.int32, (tq, tkv), 0)
        col = k_start + lax.broadcasted_iota(jnp.int32, (tq, tkv), 1)
        if not use_rope:  # ALiBi bias only in ALIBI mode (trace-time specialization)
            s = s + slopes_ref[h] * (col - row).astype(jnp.float32)
        s = jnp.where(col <= row, s, jnp.float32(-1e30))

        m_prev = m_sc[...]                                       # [tq, 1]
        m_new = jnp.maximum(m_prev, jnp.max(s, axis=-1, keepdims=True))
        alpha = jnp.exp(m_prev - m_new)
        p = jnp.exp(s - m_new)                                   # fp32 softmax math
        l_sc[...] = alpha * l_sc[...] + jnp.sum(p, axis=-1, keepdims=True)
        pv = lax.dot_general(
            p.astype(jnp.bfloat16), v_ref[...],
            dimension_numbers=(((1,), (0,)), ((), ())),
            preferred_element_type=jnp.float32,
        )
        acc_sc[...] = alpha * acc_sc[...] + pv
        m_sc[...] = m_new

    @pl.when(ki == num_kv - 1)
    def _finalize():
        inv_l = pl.reciprocal(l_sc[...], approx=True)            # EUP slot, ~free
        o_ref[...] = (acc_sc[...] * inv_l).astype(o_ref.dtype)


def pallas_flash_attention(qkv, cos, sin, alibi_slopes, *, num_heads, head_dim,
                           scale, use_rope, q_block=128, kv_block=128):
    S = qkv.shape[0]
    nH, D = num_heads, head_dim
    assert qkv.shape[1] == 3 * nH * D
    tq = min(q_block, S)
    tkv = min(kv_block, S)
    assert S % tq == 0 and S % tkv == 0, "sequence must tile evenly"
    grid = (nH, S // tq, S // tkv)

    # q / k / v are column slices of the packed [S, 3H] QKV tensor: head h lives at
    # column-block h (q), nH + h (k), 2*nH + h (v).  No split / reshape / transpose.
    #
    # kv-side index_maps are clamped to the last kv block that intersects the causal
    # region of q tile `qi`: for fully-masked tiles the block index is unchanged from
    # the previous grid step, so the pipeline skips the HBM->VMEM DMA entirely.
    def _kv_row_block(qi, ki):
        last = ((qi + 1) * tq - 1) // tkv
        return jnp.minimum(ki, last)

    q_spec = pl.BlockSpec((tq, D), lambda h, qi, ki: (qi, h))
    k_spec = pl.BlockSpec((tkv, D), lambda h, qi, ki: (_kv_row_block(qi, ki), nH + h))
    v_spec = pl.BlockSpec((tkv, D), lambda h, qi, ki: (_kv_row_block(qi, ki), 2 * nH + h))
    out_spec = pl.BlockSpec((tq, D), lambda h, qi, ki: (qi, h))

    kernel = functools.partial(
        _flash_attn_kernel, scale=scale, tq=tq, tkv=tkv, head_dim=D, use_rope=use_rope
    )

    if use_rope:
        in_specs = [
            q_spec, k_spec, v_spec,
            pl.BlockSpec((tq, D), lambda h, qi, ki: (qi, 0)),                       # cos for q rows
            pl.BlockSpec((tq, D), lambda h, qi, ki: (qi, 0)),                       # sin for q rows
            pl.BlockSpec((tkv, D), lambda h, qi, ki: (_kv_row_block(qi, ki), 0)),   # cos for kv rows
            pl.BlockSpec((tkv, D), lambda h, qi, ki: (_kv_row_block(qi, ki), 0)),   # sin for kv rows
        ]
        args = (qkv, qkv, qkv, cos, sin, cos, sin)
    else:
        in_specs = [
            pl.BlockSpec(memory_space=pltpu.MemorySpace.SMEM),  # ALiBi slopes [nH]
            q_spec, k_spec, v_spec,
        ]
        args = (alibi_slopes, qkv, qkv, qkv)

    return pl.pallas_call(
        kernel,
        out_shape=jax.ShapeDtypeStruct((S, nH * D), qkv.dtype),
        grid_spec=pltpu.PrefetchScalarGridSpec(
            num_scalar_prefetch=0,
            grid=grid,
            in_specs=in_specs,
            out_specs=out_spec,
            scratch_shapes=[
                pltpu.VMEM((tq, 1), jnp.float32),     # running max
                pltpu.VMEM((tq, 1), jnp.float32),     # running sum
                pltpu.VMEM((tq, D), jnp.float32),     # output accumulator
                pltpu.VMEM((tq, D), jnp.bfloat16),    # cached RoPE'd + scaled q tile
            ],
        ),
        compiler_params=pltpu.CompilerParams(
            dimension_semantics=("parallel", "parallel", "arbitrary")
        ),
    )(*args)


# ----------------------------------------------------------------------------
# Module wrapper (tp_size = 1)
# ----------------------------------------------------------------------------
class BaiChuanAttentionPallas:
    def __init__(self, hidden_size, num_heads, position_embedding,
                 rope_theta=10000.0, max_position_embeddings=8192, key=None):
        assert hidden_size % num_heads == 0
        self.hidden_size = hidden_size
        self.total_num_heads = num_heads
        self.num_heads = num_heads            # tensor_model_parallel_world_size == 1
        self.num_kv_heads = num_heads
        self.head_dim = hidden_size // num_heads
        self.position_embedding = position_embedding
        self.rope_theta = rope_theta
        self.max_position_embeddings = max_position_embeddings
        self.scaling = self.head_dim ** -0.5

        k1, k2 = jax.random.split(key)
        # Weights stored bf16 (MXU-native); master init in fp32 then quantized once.
        self.w_pack = (jax.random.normal(k1, (hidden_size, 3 * hidden_size), jnp.float32)
                       / math.sqrt(hidden_size)).astype(jnp.bfloat16)
        self.w_o = (jax.random.normal(k2, (hidden_size, hidden_size), jnp.float32)
                    / math.sqrt(hidden_size)).astype(jnp.bfloat16)

        if position_embedding == "ALIBI":
            self.alibi_slopes = _get_alibi_slopes(num_heads).astype(jnp.float32)
        else:
            self.alibi_slopes = jnp.zeros((num_heads,), jnp.float32)

    def _rope_tables(self, positions):
        """Full-width cos/sin tables laid out for the in-kernel roll(D/2) rotate-half:
           rot(x) = x * [cos, cos] + roll(x, D/2) * [-sin, sin]."""
        D = self.head_dim
        inv_freq = 1.0 / (self.rope_theta ** (jnp.arange(0, D, 2, dtype=jnp.float32) / D))
        freqs = positions.astype(jnp.float32)[:, None] * inv_freq[None, :]   # [S, D/2]
        cos = jnp.cos(freqs)
        sin = jnp.sin(freqs)
        cos_full = jnp.concatenate([cos, cos], axis=-1)      # [S, D]
        sin_full = jnp.concatenate([-sin, sin], axis=-1)     # [S, D]
        return cos_full, sin_full

    def __call__(self, positions, hidden_states):
        S, H = hidden_states.shape
        use_rope = self.position_embedding != "ALIBI"

        x = hidden_states.astype(jnp.bfloat16)
        qkv = pallas_matmul(x, self.w_pack, out_dtype=jnp.bfloat16)      # [S, 3H] bf16

        cos = sin = None
        if use_rope:
            cos, sin = self._rope_tables(positions)                      # [S, D] fp32

        attn = pallas_flash_attention(
            qkv, cos, sin, self.alibi_slopes,
            num_heads=self.num_heads, head_dim=self.head_dim,
            scale=self.scaling, use_rope=use_rope,
            q_block=128, kv_block=128,   # tunable per generation (256 on v6e/v7x)
        )                                                                # [S, H] bf16

        return pallas_matmul(attn, self.w_o, out_dtype=jnp.float32)      # [S, H] fp32


# ----------------------------------------------------------------------------
# Pure-JAX fp32 reference for verification
# ----------------------------------------------------------------------------
def reference_forward(mod, positions, hidden_states):
    S = hidden_states.shape[0]
    nH, D = mod.num_heads, mod.head_dim
    w_pack = mod.w_pack.astype(jnp.float32)
    w_o = mod.w_o.astype(jnp.float32)

    qkv = hidden_states @ w_pack
    q, k, v = jnp.split(qkv, 3, axis=-1)
    q = q.reshape(S, nH, D)
    k = k.reshape(S, nH, D)
    v = v.reshape(S, nH, D)

    if mod.position_embedding != "ALIBI":
        inv_freq = 1.0 / (mod.rope_theta ** (jnp.arange(0, D, 2, dtype=jnp.float32) / D))
        freqs = positions.astype(jnp.float32)[:, None] * inv_freq[None, :]
        cos = jnp.cos(freqs)[:, None, :]
        sin = jnp.sin(freqs)[:, None, :]

        def rot(x):
            x1, x2 = x[..., : D // 2], x[..., D // 2:]
            return jnp.concatenate([x1 * cos - x2 * sin, x2 * cos + x1 * sin], axis=-1)

        q, k = rot(q), rot(k)

    qh, kh, vh = (jnp.transpose(t, (1, 0, 2)) for t in (q, k, v))
    s = jnp.einsum("hqd,hkd->hqk", qh, kh) * mod.scaling
    row = jnp.arange(S)[:, None]
    col = jnp.arange(S)[None, :]
    s = s + mod.alibi_slopes[:, None, None] * (col - row).astype(jnp.float32)
    s = jnp.where(col <= row, s, -1e30)
    p = jax.nn.softmax(s, axis=-1)
    oh = jnp.einsum("hqk,hkd->hqd", p, vh)
    attn = jnp.transpose(oh, (1, 0, 2)).reshape(S, -1)
    return attn @ w_o


# ----------------------------------------------------------------------------
if __name__ == "__main__":
    SEQ = 256
    HIDDEN = 256
    NUM_HEADS = 2          # head_dim = 128 (lane-aligned; matches real Baichuan head_dim)

    root = jax.random.PRNGKey(0)
    k_param_rope, k_param_alibi, k_x = jax.random.split(root, 3)

    positions = jnp.arange(SEQ, dtype=jnp.int32)
    hidden_states = jax.random.normal(k_x, (SEQ, HIDDEN), jnp.float32)

    for mode, kp in (("ROPE", k_param_rope), ("ALIBI", k_param_alibi)):
        mod = BaiChuanAttentionPallas(HIDDEN, NUM_HEADS, mode, key=kp)
        out = mod(positions, hidden_states)
        out = jax.block_until_ready(out)
        ref = reference_forward(mod, positions, hidden_states)

        assert out.shape == (SEQ, HIDDEN)
        assert bool(jnp.isfinite(out).all()), f"{mode}: non-finite output"
        rel_err = float(jnp.linalg.norm(out - ref) / (jnp.linalg.norm(ref) + 1e-6))
        # bf16 MXU operands with fp32 accumulation -> sub-percent relative error.
        assert rel_err < 3e-2, f"{mode}: relative error {rel_err}"

    print("KERNEL_OK")
</pallas_src>

<mosaic_0001>
module attributes {stable_mosaic.version = 11 : i64} {
  func.func @_matmul_kernel(%arg0: i32, %arg1: i32, %arg2: i32, %arg3: memref<256x256xbf16, #tpu.memory_space<vmem>>, %arg4: memref<256x256xbf16, #tpu.memory_space<vmem>>, %arg5: memref<256x256xbf16, #tpu.memory_space<vmem>>, %arg6: memref<256x256xf32, #tpu.memory_space<vmem>>) attributes {dimension_semantics = [#tpu.dimension_semantics<parallel>, #tpu.dimension_semantics<parallel>, #tpu.dimension_semantics<arbitrary>], iteration_bounds = array<i64: 1, 3, 1>, scalar_prefetch = 0 : i64, scratch_operands = 1 : i64, tpu.core_type = #tpu.core_type<tc>, window_params = [{transform_indices = @transform_0, window_bounds = array<i64: 256, 256>}, {transform_indices = @transform_1, window_bounds = array<i64: 256, 256>}, {transform_indices = @transform_2, window_bounds = array<i64: 256, 256>}]} {
    %c0_i32 = arith.constant 0 : i32
    %0 = arith.cmpi eq, %arg2, %c0_i32 : i32
    %1 = arith.extui %0 : i1 to i32
    %c0_i32_0 = arith.constant 0 : i32
    %2 = arith.cmpi ne, %1, %c0_i32_0 : i32
    scf.if %2 {
      %cst_10 = arith.constant 0.000000e+00 : f32
      %12 = vector.broadcast %cst_10 : f32 to vector<256x256xf32>
      %c0_11 = arith.constant 0 : index
      %c0_12 = arith.constant 0 : index
      %13 = vector.load %arg6[%c0_11, %c0_12] : memref<256x256xf32, #tpu.memory_space<vmem>>, vector<256x256xf32>
      tpu.vector_store %arg6[%c0_11, %c0_12], %12 {strides = array<i32>} : memref<256x256xf32, #tpu.memory_space<vmem>>, vector<256x256xf32>,
    } else {
    }
    %c0 = arith.constant 0 : index
    %c0_1 = arith.constant 0 : index
    %3 = vector.load %arg6[%c0, %c0_1] : memref<256x256xf32, #tpu.memory_space<vmem>>, vector<256x256xf32>
    %c0_2 = arith.constant 0 : index
    %c0_3 = arith.constant 0 : index
    %4 = vector.load %arg3[%c0_2, %c0_3] : memref<256x256xbf16, #tpu.memory_space<vmem>>, vector<256x256xbf16>
    %c0_4 = arith.constant 0 : index
    %c0_5 = arith.constant 0 : index
    %5 = vector.load %arg4[%c0_4, %c0_5] : memref<256x256xbf16, #tpu.memory_space<vmem>>, vector<256x256xbf16>
    %cst = arith.constant dense<0.000000e+00> : vector<256x256xf32>
    %6 = tpu.matmul %4, %5, %cst {dimension_numbers = #tpu.dot_dimension_numbers<[1], [0], [0], [1], [0, 0, 1, 1], [], []>} : vector<256x256xbf16>, vector<256x256xbf16>, vector<256x256xf32> -> vector<256x256xf32>
    %7 = arith.addf %3, %6 : vector<256x256xf32>
    %c0_6 = arith.constant 0 : index
    %c0_7 = arith.constant 0 : index
    %8 = vector.load %arg6[%c0_6, %c0_7] : memref<256x256xf32, #tpu.memory_space<vmem>>, vector<256x256xf32>
    tpu.vector_store %arg6[%c0_6, %c0_7], %7 {strides = array<i32>} : memref<256x256xf32, #tpu.memory_space<vmem>>, vector<256x256xf32>,
    %c0_i32_8 = arith.constant 0 : i32
    %9 = arith.cmpi eq, %arg2, %c0_i32_8 : i32
    %10 = arith.extui %9 : i1 to i32
    %c0_i32_9 = arith.constant 0 : i32
    %11 = arith.cmpi ne, %10, %c0_i32_9 : i32
    scf.if %11 {
      %c0_10 = arith.constant 0 : index
      %c0_11 = arith.constant 0 : index
      %12 = vector.load %arg6[%c0_10, %c0_11] : memref<256x256xf32, #tpu.memory_space<vmem>>, vector<256x256xf32>
      %13 = arith.truncf %12 : vector<256x256xf32> to vector<256x256xbf16>
      %c0_12 = arith.constant 0 : index
      %c0_13 = arith.constant 0 : index
      %14 = vector.load %arg5[%c0_12, %c0_13] : memref<256x256xbf16, #tpu.memory_space<vmem>>, vector<256x256xbf16>
      tpu.vector_store %arg5[%c0_12, %c0_13], %13 {strides = array<i32>} : memref<256x256xbf16, #tpu.memory_space<vmem>>, vector<256x256xbf16>,
    } else {
    }
    return
  }
  func.func @transform_0(%arg0: i32, %arg1: i32, %arg2: i32) -> (i32, i32) {
    %c0_i32 = arith.constant 0 : i32
    return %arg0, %arg2 : i32, i32
  }
  func.func @transform_1(%arg0: i32, %arg1: i32, %arg2: i32) -> (i32, i32) {
    %c0_i32 = arith.constant 0 : i32
    return %arg2, %arg1 : i32, i32
  }
  func.func @transform_2(%arg0: i32, %arg1: i32, %arg2: i32) -> (i32, i32) {
    %c0_i32 = arith.constant 0 : i32
    return %arg0, %arg1 : i32, i32
  }
}

</mosaic_0001>

<bundles_post_ra>
// kernel: tpu_custom_call.1
= control target key start
LH: loop header
LB: loop body
LE: loop exit
PB: predicated region body
PF: predicated region fallthrough
CT: control target
= control target key end

     0   :  { %7 = vsyncpa [#allocation4], 0  ;;  %s2287_s0 = inlined_call_operand.hbm [shape: bf16[256,256], index: 0, kind: input, shape index: {}]   ;;  %s2288_s1 = inlined_call_operand.hbm [shape: bf16[256,768], index: 1, kind: input, shape index: {}]   ;;  %s2289_s2 = inlined_call_operand.hbm [shape: bf16[256,768], index: 2, kind: output, shape index: {}]  }
   0x1   :  { %8 = vsyncpa [#allocation7], 0 }
   0x2   :  { %10 = vsyncpa [#allocation7 + $0x1], 0 }
   0x3   :  { %11 = vsyncpa [#allocation5], 0 }
   0x4   :  { %13 = vsyncpa [#allocation5 + $0x1], 0  ;;  %s1998_s9 = smov 0   ;;  %s2000_s10 = smov 0  }
   0x5   :  { %s2002_s11 = smov 0   ;;  %s2004_s12 = smov 0  }
   0x6   :  { %s2006_s13 = smov 0   ;;  %s2008_s14 = smov 0  }
   0x7 LB: > { %s1474_s15 = sadd.s32 4294967295, %s1972_s14   ;;  %s1475_s16 = sadd.s32 4294967294, %s1972_s14   ;;  %s1972_s14 = sphi %s2008_s14, %s19_s14   ;;  %s1968_s13 = sphi %s2006_s13, %s2314_s13   ;;  %s1964_s12 = sphi %s2004_s12, %s2313_s12   ;;  %s1960_s11 = sphi %s2002_s11, %s2312_s11   ;;  %s1956_s10 = sphi %s2000_s10, %s2311_s10   ;;  %s1952_s9 = sphi %s1998_s9, %s2310_s9  }
   0x8   : > { %p82_p0 = scmp.ne.s32.totalorder %s1960_s11, %s1956_s10  ;;  %p83_p1 = scmp.eq.s32.totalorder %s1972_s14, 0 }
   0x9   : > { %p88_p2 = scmp.ne.s32.totalorder %s1956_s10, %s1952_s9  ;;  %p2035_p3 = scmp.eq.s32.totalorder %s1474_s15, 0 }
   0xa   : > { %p2039_p4 = por %p83_p1, %p82_p0  ;;  %p114_p5 = scmp.eq.s32.totalorder %s1474_s15, 2 }
   0xb   : > { %s2296_s17 = scalar_select %p2035_p3, 1, 0 }
   0xc   : > { %p2045_p6 = por %p2035_p3, %p88_p2  ;;  %p120_p7 = scmp.eq.s32.totalorder %s1475_s16, 2 }
   0xd   : > { %p2049_p8 = por %p114_p5, %p82_p0  ;;  %p1476_p9 = scmp.ge.s32.totalorder %s1972_s14, 1 }
   0xe   : > { %s2298_s19 = scalar_select %p2045_p6, 1, 0 }
   0xf   : > { %s2299_s20 = scalar_select %p2049_p8, 1, 0 }
  0x10   : > { %p2054_p10 = por %p120_p7, %p88_p2  ;;  %p127_p11 = scmp.lt.s32.totalorder %s1972_s14, 4 }
  0x11   : > { %s1974_s23 = smov [#allocation3]   ;;  %p1674_p0 = scmp.lt.s32.totalorder %s1972_s14, 3 }
  0x12   : > { %s2300_s21 = scalar_select %p2054_p10, 1, 0 }
  0x13   : > { %p2059_p12 = pnand %p1476_p9, %p127_p11  ;;  %s145_s24 = sshll.u32 %s1974_s23, 4  ;;  %s146_s24 = int_to_ptr.vmem [resolvable:$true] %s145_s24 }
  0x14   : > { %p2074_p2 = pnand %p1674_p0, %p2039_p4  ;;  %s34_s27 = sadd.s32 1, %s1968_s13 }
  0x15   : > { %s2301_s22 = scalar_select %p2059_p12, 1, 0 }
  0x16   : > { %p1661_p13 = pneg %p2059_p12  ;;  %s1828_s30 = scalar_lea.hbm %s2287_s0, 4096 }
  0x17   : > { %s2303_s26 = scalar_select %p2074_p2, 1, 0 }
  0x18   : > { %p2068_p1 = pnand %p1661_p13, %p2035_p3  ;;  %p1829_p5 = scmp.ne.s32.totalorder %s2287_s0, %s1828_s30 }
  0x19   : > { %p1835_p4 = scmp.lt.u32.totalorder %s1828_s30, %s2287_s0 }
  0x1a   : > { %p1830_p7 = pneg %p2068_p1 }
  0x1c   : > { %p1831_p9 = pnand %p1830_p7, %p1829_p5 }
  0x1e   : > { %p1832_p11 = pneg %p1831_p9 }
  0x20   : > { %p1837_p13 = pnand %p1835_p4, %p1832_p11 }
  0x22   : > { %1840 = shalt.err (!%p1837_p13)
}
  0x23   : > { %s1841_s7 = scalar_lea.vmem %s146_s24, 4096  ;;  %p1849_p6 = scmp.lt.s32.totalorder %s146_s24, %s146_s24 }
  0x24   : > { %p1842_p0 = scmp.ne.s32.totalorder %s146_s24, %s1841_s7  ;;  %p1850_p3 = scmp.lt.s32.totalorder %s1841_s7, %s1841_s7 }
  0x26   : > { %p1844_p10 = pnand %p1842_p0, %p1830_p7  ;;  %p1851_p12 = por %p1850_p3, %p1849_p6 }
  0x28   : > { %p1845_p8 = pneg %p1844_p10 }
  0x2a   : > { %p1852_p2 = pnand %p1851_p12, %p1845_p8 }
  0x2c   : > { %1855 = shalt.err (!%p1852_p2)
}
  0x2d   : > { %s1975_s8 = smov 128   ;;  %s1976_s15 = smov 8  }
  0x2e   : > { %1664 = dma.hbm_to_vmem [thread:$0]  (!%p2068_p1), %s2287_s0, 4096, %s146_s24, [#allocation4], %s1975_s8, %s1975_s8, %s1976_s15  }
  0x2f   : > { %p36_p10 = scmp.ge.s32.totalorder %s34_s27, 3  ;;  %s75_s23 = sadd.s32 1, %s1960_s11 }
  0x30   : > { %s159_s28 = sand.u32 1, %s1960_s11   ;;  %s1587_s3 = sshll.u32 %s1968_s13, 7 }
  0x31   : > { %s2316_s27 = smov (%p36_p10, %s34_s27), 0  ;;  %s1479_s29 = sshll.u32 %s159_s28, 8 }
  0x32   : > { %s71_s30 = ssub.s32 %s1968_s13, %s2316_s27  ;;  %s2108_s5 = scalar_lea.hbm %s2288_s1, %s1587_s3 }
  0x33   : > { %p73_p3 = scmp.eq.s32.totalorder %s71_s30, 0  ;;  %s163_s24 = scalar_lea.vmem [#allocation6], %s1479_s29 }
  0x34   : > { %s173_s6 = sshll.u32 %s163_s24, 4  ;;  %s2115_s16 = scalar_lea.sflag [#allocation7], %s159_s28  ;;  %s2113_s6 = int_to_ptr.vmem [resolvable:$true] %s173_s6 }
  0x35   : > { %s2111_s7 = scalar_select %p73_p3, %s1960_s11, %s75_s23  }
  0x36   : > { %s1856_s18 = scalar_lea.hbm %s2108_s5, 4096  ;;  %p2304_p8 = scmp.ne.s32.totalorder %s2303_s26, 0 }
  0x37   : > { %p1857_p6 = scmp.ne.s32.totalorder %s2108_s5, %s1856_s18  ;;  %s1861_s25 = scalar_lea.hbm %s2288_s1, 12288 }
  0x38   : > { %p1858_p12 = pneg %p2304_p8  ;;  %p1862_p5 = scmp.lt.u32.totalorder %s2108_s5, %s2288_s1 }
  0x39   : > { %p1863_p7 = scmp.lt.u32.totalorder %s1861_s25, %s1856_s18  ;;  %p1865_p11 = scmp.lt.u32.totalorder %s1856_s18, %s2108_s5 }
  0x3a   : > { %p1859_p1 = pnand %p1858_p12, %p1857_p6 }
  0x3b   : > { %p1864_p9 = por %p1863_p7, %p1862_p5 }
  0x3c   : > { %p1860_p2 = pneg %p1859_p1 }
  0x3d   : > { %p1866_p4 = por %p1865_p11, %p1864_p9 }
  0x3f   : > { %p1867_p13 = pnand %p1866_p4, %p1860_p2 }
  0x41   : > { %1870 = shalt.err (!%p1867_p13)
}
  0x42   : > { %s1871_s23 = scalar_lea.vmem %s2113_s6, 4096  ;;  %s1977_s28 = smov [#allocation6]  }
  0x43   : > { %p1872_p0 = scmp.ne.s32.totalorder %s2113_s6, %s1871_s23  ;;  %s1876_s24 = sshll.u32 %s1977_s28, 4  ;;  %s1877_s24 = int_to_ptr.vmem [resolvable:$false] %s1876_s24 }
  0x44   : > { %s1878_s30 = scalar_lea.vmem %s1877_s24, 8192  ;;  %p1879_p6 = scmp.lt.s32.totalorder %s2113_s6, %s1877_s24 }
  0x45   : > { %p1874_p10 = pnand %p1872_p0, %p1858_p12  ;;  %p1880_p1 = scmp.lt.s32.totalorder %s1878_s30, %s1871_s23 }
  0x47   : > { %p1875_p3 = pneg %p1874_p10  ;;  %p1881_p5 = por %p1880_p1, %p1879_p6 }
  0x49   : > { %p1882_p7 = pnand %p1881_p5, %p1875_p3 }
  0x4b   : > { %1885 = shalt.err (!%p1882_p7)
}
  0x4c   : > { %s1978_s18 = smov 384   ;;  %p2305_p12 = scmp.ne.s32.totalorder %s2301_s22, 0 }
  0x4d   : > { %1668 = dma.hbm_to_vmem [thread:$0]  (!%p2304_p8), %s2108_s5, 4096, %s2113_s6, %s2115_s16, %s1978_s18, %s1975_s8, %s1976_s15  }
  0x4e   : > { %185 = sbr.rel (%p2305_p12) target bundleno = 444 (0x1bc), region = 28  ;;  %p2306_p2 = scmp.ne.s32.totalorder (!%p2305_p12), %s2296_s17, 0 }
  0x55   : > { %1939 = dma.done.wait (%p2306_p2), [#allocation4], 4096  }
  0x56   : > { %1941 = vsyncadd (%p2306_p2), [#allocation4], 4294963200  ;;  %s2152_s3 = sand.u32 1, %s1956_s10   ;;  %p2307_p8 = scmp.ne.s32.totalorder %s2298_s19, 0 }
  0x57   : > { %s1484_s26 = sshll.u32 %s2152_s3, 8  ;;  %s192_s25 = scalar_lea.sflag [#allocation7], %s2152_s3 }
  0x58   : > { %s2158_s8 = scalar_lea.vmem [#allocation6], %s1484_s26 }
  0x59   : > { %1943 = dma.done.wait (%p2307_p8), %s192_s25, 4096  }
  0x5a   : > { %1945 = vsyncadd (%p2307_p8), %s192_s25, 4294963200  ;;  %v1732_v0 = vld [vmem:[%s2158_s8 + $0x4] ss:$8 sps:$4 sm:$0xff]   ;;  %v1734_v1 = vld [vmem:[%s2158_s8] ss:$8 sps:$4 sm:$0xff]   ;;  %s2198_s17 = scalar_lea.vmem [#allocation8], %s1484_s26 }
  0x5b   : > { %738 = vmatprep.subr.bf16.mxu0 %v1732_v0  ;;  %1621 = vmatprep.subr.bf16.mxu1 %v1732_v0  ;;  %v1735_v2 = vld [vmem:[%s2158_s8 + $0x14] ss:$8 sps:$4 sm:$0xff]   ;;  %v1737_v3 = vld [vmem:[%s2158_s8 + $0x10] ss:$8 sps:$4 sm:$0xff]   ;;  %v1738_v4 = vld [vmem:[%s2158_s8 + $0x24] ss:$8 sps:$4 sm:$0xff]  }
  0x5c   : > { %739 = vmatpush1.bf16.msra.mxu0 %v1734_v1  ;;  %1637 = vmatpush1.bf16.msra.mxu1 %v1734_v1  ;;  %v1740_v5 = vld [vmem:[%s2158_s8 + $0x20] ss:$8 sps:$4 sm:$0xff]   ;;  %v1741_v6 = vld [vmem:[%s2158_s8 + $0x34] ss:$8 sps:$4 sm:$0xff]   ;;  %v1743_v7 = vld [vmem:[%s2158_s8 + $0x30] ss:$8 sps:$4 sm:$0xff]  }
  0x5d   : > { %740 = vmatprep.subr.bf16.mxu0 %v1735_v2  ;;  %1622 = vmatprep.subr.bf16.mxu1 %v1735_v2  ;;  %v1744_v8 = vld [vmem:[%s2158_s8 + $0x44] ss:$8 sps:$4 sm:$0xff]   ;;  %v1746_v9 = vld [vmem:[%s2158_s8 + $0x40] ss:$8 sps:$4 sm:$0xff]   ;;  %v1747_v10 = vld [vmem:[%s2158_s8 + $0x54] ss:$8 sps:$4 sm:$0xff]  }
  0x5e   : > { %v1749_v11 = vld [vmem:[%s2158_s8 + $0x50] ss:$8 sps:$4 sm:$0xff]   ;;  %v1750_v12 = vld [vmem:[%s2158_s8 + $0x64] ss:$8 sps:$4 sm:$0xff]   ;;  %v1752_v14 = vld [vmem:[%s2158_s8 + $0x60] ss:$8 sps:$4 sm:$0xff]  }
  0x5f   : > { %v1782_v13 = vld [vmem:[#allocation3 + $0x4] ss:$8 sps:$4 sm:$0xff]   ;;  %v1753_v16 = vld [vmem:[%s2158_s8 + $0x74] ss:$8 sps:$4 sm:$0xff]   ;;  %v1755_v17 = vld [vmem:[%s2158_s8 + $0x70] ss:$8 sps:$4 sm:$0xff]  }
  0x60   : > { %741 = vmatpush1.bf16.msra.mxu0 %v1737_v3  ;;  %1638 = vmatpush1.bf16.msra.mxu1 %v1737_v3  ;;  %v1785_v15 = vld [vmem:[#allocation3 + $0x84] ss:$8 sps:$4 sm:$0xff]   ;;  %v1758_v19 = vld [vmem:[%s2158_s8 + $0x80] ss:$8 sps:$4 sm:$0xff]   ;;  %v1759_v20 = vld [vmem:[%s2158_s8 + $0x94] ss:$8 sps:$4 sm:$0xff]  }
  0x61   : > { %742 = vmatprep.subr.bf16.mxu0 %v1738_v4  ;;  %1623 = vmatprep.subr.bf16.mxu1 %v1738_v4  ;;  %v1756_v18 = vld [vmem:[%s2158_s8 + $0x84] ss:$8 sps:$4 sm:$0xff]   ;;  %v1761_v21 = vld [vmem:[%s2158_s8 + $0x90] ss:$8 sps:$4 sm:$0xff]   ;;  %v1764_v23 = vld [vmem:[%s2158_s8 + $0xa0] ss:$8 sps:$4 sm:$0xff]  }
  0x62   : > { %770 = vmatprep.mubr.bf16.mxu0 %v1782_v13  ;;  %850 = vmatprep.mubr.bf16.mxu1 %v1785_v15  ;;  %v1762_v22 = vld [vmem:[%s2158_s8 + $0xa4] ss:$8 sps:$4 sm:$0xff]   ;;  %v1765_v24 = vld [vmem:[%s2158_s8 + $0xb4] ss:$8 sps:$4 sm:$0xff]   ;;  %v1767_v25 = vld [vmem:[%s2158_s8 + $0xb0] ss:$8 sps:$4 sm:$0xff]  }
  0x63   : > { %v1768_v26 = vld [vmem:[%s2158_s8 + $0xc4] ss:$8 sps:$4 sm:$0xff]   ;;  %v1770_v27 = vld [vmem:[%s2158_s8 + $0xc0] ss:$8 sps:$4 sm:$0xff]   ;;  %v1771_v28 = vld [vmem:[%s2158_s8 + $0xd4] ss:$8 sps:$4 sm:$0xff]  }
  0x64   : > { %743 = vmatpush1.bf16.msra.mxu0 %v1740_v5  ;;  %1639 = vmatpush1.bf16.msra.mxu1 %v1740_v5  ;;  %v1773_v29 = vld [vmem:[%s2158_s8 + $0xd0] ss:$8 sps:$4 sm:$0xff]   ;;  %v1774_v30 = vld [vmem:[%s2158_s8 + $0xe4] ss:$8 sps:$4 sm:$0xff]   ;;  %v1776_v31 = vld [vmem:[%s2158_s8 + $0xe0] ss:$8 sps:$4 sm:$0xff]  }
  0x65   : > { %744 = vmatprep.subr.bf16.mxu0 %v1741_v6  ;;  %1624 = vmatprep.subr.bf16.mxu1 %v1741_v6  ;;  %v1777_v32 = vld [vmem:[%s2158_s8 + $0xf4] ss:$8 sps:$4 sm:$0xff]   ;;  %v1779_v33 = vld [vmem:[%s2158_s8 + $0xf0] ss:$8 sps:$4 sm:$0xff]   ;;  %v1780_v34 = vld [vmem:[#allocation3] ss:$8 sps:$4 sm:$0xff]  }
  0x66   : > { %v1783_v35 = vld [vmem:[#allocation3 + $0x80] ss:$8 sps:$4 sm:$0xff]   ;;  %v1786_v36 = vld [vmem:[#allocation3 + $0x14] ss:$8 sps:$4 sm:$0xff]   ;;  %v1790_v38 = vld [vmem:[#allocation3 + $0x10] ss:$8 sps:$4 sm:$0xff]  }
  0x67   : > { %v1788_v37 = vld [vmem:[#allocation3 + $0x94] ss:$8 sps:$4 sm:$0xff]   ;;  %v1791_v39 = vld [vmem:[#allocation3 + $0x90] ss:$8 sps:$4 sm:$0xff]   ;;  %v1792_v40 = vld [vmem:[#allocation3 + $0x24] ss:$8 sps:$4 sm:$0xff]  }
  0x68   : > { %745 = vmatpush1.bf16.msra.mxu0 %v1743_v7  ;;  %1640 = vmatpush1.bf16.msra.mxu1 %v1743_v7  ;;  %v1794_v41 = vld [vmem:[#allocation3 + $0xa4] ss:$8 sps:$4 sm:$0xff]   ;;  %v1796_v42 = vld [vmem:[#allocation3 + $0x20] ss:$8 sps:$4 sm:$0xff]   ;;  %v1798_v44 = vld [vmem:[#allocation3 + $0x34] ss:$8 sps:$4 sm:$0xff]  }
  0x69   : > { %746 = vmatprep.subr.bf16.mxu0 %v1744_v8  ;;  %1625 = vmatprep.subr.bf16.mxu1 %v1744_v8  ;;  %v1797_v43 = vld [vmem:[#allocation3 + $0xa0] ss:$8 sps:$4 sm:$0xff]   ;;  %v1800_v45 = vld [vmem:[#allocation3 + $0xb4] ss:$8 sps:$4 sm:$0xff]   ;;  %v1802_v46 = vld [vmem:[#allocation3 + $0x30] ss:$8 sps:$4 sm:$0xff]  }
  0x6a   : > { %v1803_v47 = vld [vmem:[#allocation3 + $0xb0] ss:$8 sps:$4 sm:$0xff]   ;;  %v1804_v48 = vld [vmem:[#allocation3 + $0x44] ss:$8 sps:$4 sm:$0xff]   ;;  %v1808_v50 = vld [vmem:[#allocation3 + $0x40] ss:$8 sps:$4 sm:$0xff]  }
  0x6b   : > { %v1806_v49 = vld [vmem:[#allocation3 + $0xc4] ss:$8 sps:$4 sm:$0xff]   ;;  %v1809_v51 = vld [vmem:[#allocation3 + $0xc0] ss:$8 sps:$4 sm:$0xff]   ;;  %v1810_v52 = vld [vmem:[#allocation3 + $0x54] ss:$8 sps:$4 sm:$0xff]  }
  0x6c   : > { %747 = vmatpush1.bf16.msra.mxu0 %v1746_v9  ;;  %1641 = vmatpush1.bf16.msra.mxu1 %v1746_v9  ;;  %v1812_v53 = vld [vmem:[#allocation3 + $0xd4] ss:$8 sps:$4 sm:$0xff]   ;;  %v1814_v54 = vld [vmem:[#allocation3 + $0x50] ss:$8 sps:$4 sm:$0xff]   ;;  %v1816_v56 = vld [vmem:[#allocation3 + $0x64] ss:$8 sps:$4 sm:$0xff]  }
  0x6d   : > { %748 = vmatprep.subr.bf16.mxu0 %v1747_v10  ;;  %1626 = vmatprep.subr.bf16.mxu1 %v1747_v10  ;;  %v1815_v55 = vld [vmem:[#allocation3 + $0xd0] ss:$8 sps:$4 sm:$0xff]   ;;  %v1818_v57 = vld [vmem:[#allocation3 + $0xe4] ss:$8 sps:$4 sm:$0xff]   ;;  %v1820_v58 = vld [vmem:[#allocation3 + $0x60] ss:$8 sps:$4 sm:$0xff]  }
  0x6e   : > { %v1821_v59 = vld [vmem:[#allocation3 + $0xe0] ss:$8 sps:$4 sm:$0xff]   ;;  %v1822_v60 = vld [vmem:[#allocation3 + $0x74] ss:$8 sps:$4 sm:$0xff]   ;;  %v1826_v62 = vld [vmem:[#allocation3 + $0x70] ss:$8 sps:$4 sm:$0xff]  }
  0x6f   : > { %v1824_v61 = vld [vmem:[#allocation3 + $0xf4] ss:$8 sps:$4 sm:$0xff]   ;;  %v1827_v63 = vld [vmem:[#allocation3 + $0xf0] ss:$8 sps:$4 sm:$0xff]   ;;  %s1620_s19 = sshll.u32 %s1964_s12, 7  ;;  %s1367_s22 = sshll.u32 %s2198_s17, 4  ;;  %s2235_s22 = int_to_ptr.vmem [resolvable:$true] %s1367_s22 }
  0x70   : > { %749 = vmatpush1.bf16.msra.mxu0 %v1749_v11  ;;  %1642 = vmatpush1.bf16.msra.mxu1 %v1749_v11  ;;  %s2233_s6 = scalar_lea.hbm %s2289_s2, %s1620_s19  ;;  %s1351_s12 = scalar_lea.sflag [#allocation5], %s2152_s3 }
  0x71   : > { %750 = vmatprep.subr.bf16.mxu0 %v1750_v12  ;;  %1627 = vmatprep.subr.bf16.mxu1 %v1750_v12  ;;  %s1886_s16 = scalar_lea.vmem %s2235_s22, 4096  ;;  %p2308_p11 = scmp.ne.s32.totalorder %s2299_s20, 0 }
  0x72   : > { %p1887_p9 = scmp.ne.s32.totalorder %s2235_s22, %s1886_s16  ;;  %s1979_s29 = smov [#allocation8]  }
  0x73   : > { %s1890_s4 = sshll.u32 %s1979_s29, 4  ;;  %s1891_s4 = int_to_ptr.vmem [resolvable:$false] %s1890_s4 }
  0x74   : > { %751 = vmatpush1.bf16.msra.mxu0 %v1752_v14  ;;  %1643 = vmatpush1.bf16.msra.mxu1 %v1752_v14  ;;  %p1888_p4 = pnand %p1887_p9, %p2308_p11  ;;  %s1892_s23 = scalar_lea.vmem %s1891_s4, 8192 }
  0x75   : > { %752 = vmatprep.subr.bf16.mxu0 %v1753_v16  ;;  %1628 = vmatprep.subr.bf16.mxu1 %v1753_v16  ;;  %p1893_p0 = scmp.lt.s32.totalorder %s2235_s22, %s1891_s4  ;;  %p1894_p10 = scmp.lt.s32.totalorder %s1892_s23, %s1886_s16 }
  0x76   : > { %p1889_p13 = pneg %p1888_p4 }
  0x77   : > { %p1895_p3 = por %p1894_p10, %p1893_p0 }
  0x78   : > { %753 = vmatpush1.bf16.msra.mxu0 %v1755_v17  ;;  %1644 = vmatpush1.bf16.msra.mxu1 %v1755_v17 }
  0x79   : > { %754 = vmatprep.subr.bf16.mxu0 %v1756_v18  ;;  %1629 = vmatprep.subr.bf16.mxu1 %v1756_v18  ;;  %p1896_p6 = pnand %p1895_p3, %p1889_p13 }
  0x7c   : > { %755 = vmatpush1.bf16.msra.mxu0 %v1758_v19  ;;  %1645 = vmatpush1.bf16.msra.mxu1 %v1758_v19 }
  0x7d   : > { %756 = vmatprep.subr.bf16.mxu0 %v1759_v20  ;;  %1630 = vmatprep.subr.bf16.mxu1 %v1759_v20 }
  0x80   : > { %757 = vmatpush1.bf16.msra.mxu0 %v1761_v21  ;;  %1646 = vmatpush1.bf16.msra.mxu1 %v1761_v21 }
  0x81   : > { %758 = vmatprep.subr.bf16.mxu0 %v1762_v22  ;;  %1631 = vmatprep.subr.bf16.mxu1 %v1762_v22 }
  0x84   : > { %759 = vmatpush1.bf16.msra.mxu0 %v1764_v23  ;;  %1647 = vmatpush1.bf16.msra.mxu1 %v1764_v23 }
  0x85   : > { %760 = vmatprep.subr.bf16.mxu0 %v1765_v24  ;;  %1632 = vmatprep.subr.bf16.mxu1 %v1765_v24 }
  0x88   : > { %761 = vmatpush1.bf16.msra.mxu0 %v1767_v25  ;;  %1648 = vmatpush1.bf16.msra.mxu1 %v1767_v25 }
  0x89   : > { %762 = vmatprep.subr.bf16.mxu0 %v1768_v26  ;;  %1633 = vmatprep.subr.bf16.mxu1 %v1768_v26 }
  0x8c   : > { %763 = vmatpush1.bf16.msra.mxu0 %v1770_v27  ;;  %1649 = vmatpush1.bf16.msra.mxu1 %v1770_v27 }
  0x8d   : > { %764 = vmatprep.subr.bf16.mxu0 %v1771_v28  ;;  %1634 = vmatprep.subr.bf16.mxu1 %v1771_v28 }
  0x90   : > { %765 = vmatpush1.bf16.msra.mxu0 %v1773_v29  ;;  %1650 = vmatpush1.bf16.msra.mxu1 %v1773_v29 }
  0x91   : > { %766 = vmatprep.subr.bf16.mxu0 %v1774_v30  ;;  %1635 = vmatprep.subr.bf16.mxu1 %v1774_v30 }
  0x94   : > { %767 = vmatpush1.bf16.msra.mxu0 %v1776_v31  ;;  %1651 = vmatpush1.bf16.msra.mxu1 %v1776_v31 }
  0x95   : > { %768 = vmatprep.subr.bf16.mxu0 %v1777_v32  ;;  %1636 = vmatprep.subr.bf16.mxu1 %v1777_v32 }
  0x98   : > { %769 = vmatpush1.bf16.msra.mxu0 %v1779_v33  ;;  %1652 = vmatpush1.bf16.msra.mxu1 %v1779_v33 }
  0x9b   : > { %771 = vmatmul.mubr.bf16.vlgmr.msra.gmra.mrb[0].mxu0 %v1780_v34  ;;  %851 = vmatmul.mubr.bf16.vlgmr.msra.gmra.mrb[0].mxu1 %v1783_v35 }
  0x9c   : > { %780 = vmatprep.mubr.bf16.mxu0 %v1786_v36  ;;  %860 = vmatprep.mubr.bf16.mxu1 %v1788_v37 }
  0xa3   : > { %781 = vmatmul.mubr.bf16.gmra.mrb[4].mxu0 %v1790_v38  ;;  %861 = vmatmul.mubr.bf16.gmra.mrb[4].mxu1 %v1791_v39 }
  0xa4   : > { %790 = vmatprep.mubr.bf16.mxu0 %v1792_v40  ;;  %870 = vmatprep.mubr.bf16.mxu1 %v1794_v41 }
  0xab   : > { %791 = vmatmul.mubr.bf16.gmra.mrb[8].mxu0 %v1796_v42  ;;  %871 = vmatmul.mubr.bf16.gmra.mrb[8].mxu1 %v1797_v43 }
  0xac   : > { %800 = vmatprep.mubr.bf16.mxu0 %v1798_v44  ;;  %880 = vmatprep.mubr.bf16.mxu1 %v1800_v45 }
  0xb3   : > { %801 = vmatmul.mubr.bf16.gmra.mrb[12].mxu0 %v1802_v46  ;;  %881 = vmatmul.mubr.bf16.gmra.mrb[12].mxu1 %v1803_v47 }
  0xb4   : > { %810 = vmatprep.mubr.bf16.mxu0 %v1804_v48  ;;  %890 = vmatprep.mubr.bf16.mxu1 %v1806_v49 }
  0xbb   : > { %811 = vmatmul.mubr.bf16.gmra.mrb[16].mxu0 %v1808_v50  ;;  %891 = vmatmul.mubr.bf16.gmra.mrb[16].mxu1 %v1809_v51 }
  0xbc   : > { %820 = vmatprep.mubr.bf16.mxu0 %v1810_v52  ;;  %900 = vmatprep.mubr.bf16.mxu1 %v1812_v53 }
  0xc3   : > { %821 = vmatmul.mubr.bf16.gmra.mrb[20].mxu0 %v1814_v54  ;;  %901 = vmatmul.mubr.bf16.gmra.mrb[20].mxu1 %v1815_v55 }
  0xc4   : > { %830 = vmatprep.mubr.bf16.mxu0 %v1816_v56  ;;  %910 = vmatprep.mubr.bf16.mxu1 %v1818_v57 }
  0xcb   : > { %831 = vmatmul.mubr.bf16.gmra.mrb[24].mxu0 %v1820_v58  ;;  %911 = vmatmul.mubr.bf16.gmra.mrb[24].mxu1 %v1821_v59 }
  0xcc   : > { %840 = vmatprep.mubr.bf16.mxu0 %v1822_v60  ;;  %920 = vmatprep.mubr.bf16.mxu1 %v1824_v61 }
  0xd3   : > { %841 = vmatmul.mubr.bf16.gmra.mrb[28].mxu0 %v1826_v62  ;;  %921 = vmatmul.mubr.bf16.gmra.mrb[28].mxu1 %v1827_v63 }
 0x16e   : > { %v772_v0 = vpop.f32.mrb[0].mxu0  ;;  %v852_v1 = vpop.f32.mrb[0].mxu1 }
 0x16f   : > { %v774_v2 = vpop.f32.mrb[1].mxu0  ;;  %v854_v3 = vpop.f32.mrb[1].mxu1 }
 0x170   : > { %v1588_v4 = vpack.c.bf16 %v774_v2, %v772_v0  ;;  %v1604_v5 = vpack.c.bf16 %v854_v3, %v852_v1  ;;  %v776_v6 = vpop.f32.mrb[2].mxu0  ;;  %v856_v7 = vpop.f32.mrb[2].mxu1 }
 0x171   : > { %v778_v8 = vpop.f32.mrb[3].mxu0  ;;  %v858_v9 = vpop.f32.mrb[3].mxu1 }
 0x172   : > { %1318 = vst [vmem:[%s2198_s17] sm:$0xff] %v1588_v4  ;;  %1334 = vst [vmem:[%s2198_s17 + $0x80] sm:$0xff] %v1604_v5  ;;  %v1589_v10 = vpack.c.bf16 %v778_v8, %v776_v6  ;;  %v1605_v11 = vpack.c.bf16 %v858_v9, %v856_v7 }
 0x174   : > { %1319 = vst [vmem:[%s2198_s17 + $0x8] sm:$0xff] %v1589_v10  ;;  %1335 = vst [vmem:[%s2198_s17 + $0x88] sm:$0xff] %v1605_v11 }
 0x176   : > { %v782_v12 = vpop.f32.mrb[4].mxu0  ;;  %v862_v13 = vpop.f32.mrb[4].mxu1 }
 0x177   : > { %v784_v14 = vpop.f32.mrb[5].mxu0  ;;  %v864_v15 = vpop.f32.mrb[5].mxu1 }
 0x178   : > { %v1590_v16 = vpack.c.bf16 %v784_v14, %v782_v12  ;;  %v1606_v17 = vpack.c.bf16 %v864_v15, %v862_v13  ;;  %v786_v18 = vpop.f32.mrb[6].mxu0  ;;  %v866_v19 = vpop.f32.mrb[6].mxu1 }
 0x179   : > { %v788_v20 = vpop.f32.mrb[7].mxu0  ;;  %v868_v21 = vpop.f32.mrb[7].mxu1 }
 0x17a   : > { %1320 = vst [vmem:[%s2198_s17 + $0x10] sm:$0xff] %v1590_v16  ;;  %1336 = vst [vmem:[%s2198_s17 + $0x90] sm:$0xff] %v1606_v17  ;;  %v1591_v22 = vpack.c.bf16 %v788_v20, %v786_v18  ;;  %v1607_v23 = vpack.c.bf16 %v868_v21, %v866_v19 }
 0x17c   : > { %1321 = vst [vmem:[%s2198_s17 + $0x18] sm:$0xff] %v1591_v22  ;;  %1337 = vst [vmem:[%s2198_s17 + $0x98] sm:$0xff] %v1607_v23 }
 0x17e   : > { %v792_v24 = vpop.f32.mrb[8].mxu0  ;;  %v872_v25 = vpop.f32.mrb[8].mxu1 }
 0x17f   : > { %v794_v26 = vpop.f32.mrb[9].mxu0  ;;  %v874_v27 = vpop.f32.mrb[9].mxu1 }
 0x180   : > { %v1592_v28 = vpack.c.bf16 %v794_v26, %v792_v24  ;;  %v1608_v29 = vpack.c.bf16 %v874_v27, %v872_v25  ;;  %v796_v30 = vpop.f32.mrb[10].mxu0  ;;  %v876_v31 = vpop.f32.mrb[10].mxu1 }
 0x181   : > { %v798_v32 = vpop.f32.mrb[11].mxu0  ;;  %v878_v33 = vpop.f32.mrb[11].mxu1 }
 0x182   : > { %1322 = vst [vmem:[%s2198_s17 + $0x20] sm:$0xff] %v1592_v28  ;;  %1338 = vst [vmem:[%s2198_s17 + $0xa0] sm:$0xff] %v1608_v29  ;;  %v1593_v34 = vpack.c.bf16 %v798_v32, %v796_v30  ;;  %v1609_v35 = vpack.c.bf16 %v878_v33, %v876_v31 }
 0x184   : > { %1323 = vst [vmem:[%s2198_s17 + $0x28] sm:$0xff] %v1593_v34  ;;  %1339 = vst [vmem:[%s2198_s17 + $0xa8] sm:$0xff] %v1609_v35 }
 0x186   : > { %v802_v36 = vpop.f32.mrb[12].mxu0  ;;  %v882_v37 = vpop.f32.mrb[12].mxu1 }
 0x187   : > { %v804_v38 = vpop.f32.mrb[13].mxu0  ;;  %v884_v39 = vpop.f32.mrb[13].mxu1 }
 0x188   : > { %v1594_v40 = vpack.c.bf16 %v804_v38, %v802_v36  ;;  %v1610_v41 = vpack.c.bf16 %v884_v39, %v882_v37  ;;  %v806_v42 = vpop.f32.mrb[14].mxu0  ;;  %v886_v43 = vpop.f32.mrb[14].mxu1 }
 0x189   : > { %v808_v44 = vpop.f32.mrb[15].mxu0  ;;  %v888_v45 = vpop.f32.mrb[15].mxu1 }
 0x18a   : > { %1324 = vst [vmem:[%s2198_s17 + $0x30] sm:$0xff] %v1594_v40  ;;  %1340 = vst [vmem:[%s2198_s17 + $0xb0] sm:$0xff] %v1610_v41  ;;  %v1595_v46 = vpack.c.bf16 %v808_v44, %v806_v42  ;;  %v1611_v47 = vpack.c.bf16 %v888_v45, %v886_v43 }
 0x18c   : > { %1325 = vst [vmem:[%s2198_s17 + $0x38] sm:$0xff] %v1595_v46  ;;  %1341 = vst [vmem:[%s2198_s17 + $0xb8] sm:$0xff] %v1611_v47 }
 0x18e   : > { %v812_v48 = vpop.f32.mrb[16].mxu0  ;;  %v892_v49 = vpop.f32.mrb[16].mxu1 }
 0x18f   : > { %v814_v50 = vpop.f32.mrb[17].mxu0  ;;  %v894_v51 = vpop.f32.mrb[17].mxu1 }
 0x190   : > { %v1596_v52 = vpack.c.bf16 %v814_v50, %v812_v48  ;;  %v1612_v53 = vpack.c.bf16 %v894_v51, %v892_v49  ;;  %v816_v54 = vpop.f32.mrb[18].mxu0  ;;  %v896_v55 = vpop.f32.mrb[18].mxu1 }
 0x191   : > { %v818_v56 = vpop.f32.mrb[19].mxu0  ;;  %v898_v57 = vpop.f32.mrb[19].mxu1 }
 0x192   : > { %1326 = vst [vmem:[%s2198_s17 + $0x40] sm:$0xff] %v1596_v52  ;;  %1342 = vst [vmem:[%s2198_s17 + $0xc0] sm:$0xff] %v1612_v53  ;;  %v1597_v58 = vpack.c.bf16 %v818_v56, %v816_v54  ;;  %v1613_v59 = vpack.c.bf16 %v898_v57, %v896_v55 }
 0x194   : > { %1327 = vst [vmem:[%s2198_s17 + $0x48] sm:$0xff] %v1597_v58  ;;  %1343 = vst [vmem:[%s2198_s17 + $0xc8] sm:$0xff] %v1613_v59 }
 0x196   : > { %v822_v60 = vpop.f32.mrb[20].mxu0  ;;  %v902_v61 = vpop.f32.mrb[20].mxu1 }
 0x197   : > { %v824_v62 = vpop.f32.mrb[21].mxu0  ;;  %v904_v63 = vpop.f32.mrb[21].mxu1 }
 0x198   : > { %v1598_v0 = vpack.c.bf16 %v824_v62, %v822_v60  ;;  %v1614_v1 = vpack.c.bf16 %v904_v63, %v902_v61  ;;  %v826_v2 = vpop.f32.mrb[22].mxu0  ;;  %v906_v3 = vpop.f32.mrb[22].mxu1 }
 0x199   : > { %v828_v4 = vpop.f32.mrb[23].mxu0  ;;  %v908_v5 = vpop.f32.mrb[23].mxu1 }
 0x19a   : > { %1328 = vst [vmem:[%s2198_s17 + $0x50] sm:$0xff] %v1598_v0  ;;  %1344 = vst [vmem:[%s2198_s17 + $0xd0] sm:$0xff] %v1614_v1  ;;  %v1599_v6 = vpack.c.bf16 %v828_v4, %v826_v2  ;;  %v1615_v7 = vpack.c.bf16 %v908_v5, %v906_v3 }
 0x19c   : > { %1329 = vst [vmem:[%s2198_s17 + $0x58] sm:$0xff] %v1599_v6  ;;  %1345 = vst [vmem:[%s2198_s17 + $0xd8] sm:$0xff] %v1615_v7 }
 0x19e   : > { %v832_v8 = vpop.f32.mrb[24].mxu0  ;;  %v912_v9 = vpop.f32.mrb[24].mxu1 }
 0x19f   : > { %v834_v10 = vpop.f32.mrb[25].mxu0  ;;  %v914_v11 = vpop.f32.mrb[25].mxu1 }
 0x1a0   : > { %v1600_v12 = vpack.c.bf16 %v834_v10, %v832_v8  ;;  %v1616_v13 = vpack.c.bf16 %v914_v11, %v912_v9  ;;  %v836_v14 = vpop.f32.mrb[26].mxu0  ;;  %v916_v15 = vpop.f32.mrb[26].mxu1 }
 0x1a1   : > { %v838_v16 = vpop.f32.mrb[27].mxu0  ;;  %v918_v17 = vpop.f32.mrb[27].mxu1 }
 0x1a2   : > { %1330 = vst [vmem:[%s2198_s17 + $0x60] sm:$0xff] %v1600_v12  ;;  %1346 = vst [vmem:[%s2198_s17 + $0xe0] sm:$0xff] %v1616_v13  ;;  %v1601_v18 = vpack.c.bf16 %v838_v16, %v836_v14  ;;  %v1617_v19 = vpack.c.bf16 %v918_v17, %v916_v15 }
 0x1a4   : > { %1331 = vst [vmem:[%s2198_s17 + $0x68] sm:$0xff] %v1601_v18  ;;  %1347 = vst [vmem:[%s2198_s17 + $0xe8] sm:$0xff] %v1617_v19 }
 0x1a6   : > { %v842_v20 = vpop.f32.mrb[28].mxu0  ;;  %v922_v21 = vpop.f32.mrb[28].mxu1 }
 0x1a7   : > { %v844_v22 = vpop.f32.mrb[29].mxu0  ;;  %v924_v23 = vpop.f32.mrb[29].mxu1 }
 0x1a8   : > { %v1602_v24 = vpack.c.bf16 %v844_v22, %v842_v20  ;;  %v1618_v25 = vpack.c.bf16 %v924_v23, %v922_v21  ;;  %v846_v26 = vpop.f32.mrb[30].mxu0  ;;  %v926_v27 = vpop.f32.mrb[30].mxu1 }
 0x1a9   : > { %v848_v28 = vpop.f32.mrb[31].mxu0  ;;  %v928_v29 = vpop.f32.mrb[31].mxu1 }
 0x1aa   : > { %1332 = vst [vmem:[%s2198_s17 + $0x70] sm:$0xff] %v1602_v24  ;;  %1348 = vst [vmem:[%s2198_s17 + $0xf0] sm:$0xff] %v1618_v25  ;;  %v1603_v30 = vpack.c.bf16 %v848_v28, %v846_v26  ;;  %v1619_v31 = vpack.c.bf16 %v928_v29, %v926_v27 }
 0x1ac   : > { %1333 = vst [vmem:[%s2198_s17 + $0x78] sm:$0xff] %v1603_v30  ;;  %1349 = vst [vmem:[%s2198_s17 + $0xf8] sm:$0xff] %v1619_v31 }
 0x1ad   : > { %1899 = shalt.err (!%p1896_p6)
}
 0x1ae   : > { %s1900_s28 = scalar_lea.hbm %s2233_s6, 4096  ;;  %s1904_s18 = scalar_lea.hbm %s2289_s2, 12288 }
 0x1af   : > { %p1901_p1 = scmp.ne.s32.totalorder %s2233_s6, %s1900_s28  ;;  %p1905_p12 = scmp.lt.u32.totalorder %s2233_s6, %s2289_s2 }
 0x1b0   : > { %p1906_p2 = scmp.lt.u32.totalorder %s1904_s18, %s1900_s28  ;;  %p1908_p9 = scmp.lt.u32.totalorder %s1900_s28, %s2233_s6 }
 0x1b1   : > { %p1902_p5 = pnand %p1901_p1, %p2308_p11 }
 0x1b2   : > { %p1907_p8 = por %p1906_p2, %p1905_p12 }
 0x1b3   : > { %p1903_p7 = pneg %p1902_p5 }
 0x1b4   : > { %p1909_p4 = por %p1908_p9, %p1907_p8 }
 0x1b6   : > { %p1910_p13 = pnand %p1909_p4, %p1903_p7 }
 0x1b8   : > { %1913 = shalt.err (!%p1910_p13)
}
 0x1b9   : > { %s1980_s8 = smov 128   ;;  %s1981_s17 = smov 384  }
 0x1ba   : > { %s1982_s19 = smov 8  }
 0x1bb   : > { %1659 = dma.vmem_to_hbm [thread:$0]  (%p2308_p11), %s2235_s22, 4096, %s2233_s6, %s1351_s12, %s1980_s8, %s1981_s17, %s1982_s19  }
 0x1bc PF: > { %p1676_p0 = scmp.ge.s32.totalorder %s1972_s14, 2  ;;  %s1382_s15 = sand.u32 1, %s1952_s9  }
 0x1bd   : > { %p2309_p10 = scmp.ne.s32.totalorder %s2300_s21, 0  ;;  %s1383_s5 = scalar_lea.sflag [#allocation5], %s1382_s15 }
 0x1bf   : > { %p1670_p3 = pnand %p1676_p0, %p2309_p10 }
 0x1c1   : > { %1947 = dma.done.wait (!%p1670_p3), %s1383_s5, 4096  }
 0x1c2   : > { %1949 = vsyncadd (!%p1670_p3), %s1383_s5, 4294963200  ;;  %s19_s14 = sadd.s32 1, %s1972_s14   ;;  %s2310_s9 = smov %s1956_s10 }
 0x1c3   : > { %p16_p6 = scmp.ge.s32.totalorder %s19_s14, 5   ;;  %s2311_s10 = smov %s1960_s11 }
 0x1c4   : > { %s2312_s11 = smov %s2111_s7  ;;  %s2313_s12 = smov %s1968_s13 }
 0x1c5   : > { %s2314_s13 = smov %s2316_s27  ;;  %18 = sbr.rel (!%p16_p6) target bundleno = 7 (0x7), region = 87 }
 0x1cc   :  { %1388 = vsyncpa [#allocation4], 1 }
 0x1cd   :  { %1390 = vsyncpa [#allocation4 + $0x1], 1 }
 0x1ce   :  { %1391 = vsyncpa [#allocation7], 1 }
 0x1cf   :  { %1393 = vsyncpa [#allocation7 + $0x1], 1 }
 0x1d0   :  { %1394 = vsyncpa [#allocation5], 1 }
 0x1d1   :  { %1396 = vsyncpa [#allocation5 + $0x1], 1 }

</bundles_post_ra>
